<compile_context>
chip_gen: v7x
topology: tpu7x:2x2x1
jax: 0.10.0
libtpu: 0.0.40
codegen_flags: <defaults>
</compile_context>

<pallas_src>
import jax
import jax.numpy as jnp
from jax.experimental import pallas as pl
from jax.experimental.pallas import tpu as pltpu

LANE = 128


# ---------------------------------------------------------------------------
# Kernel 1: streaming masked sum over the sequence axis
# ---------------------------------------------------------------------------
def masked_sum_kernel(embeds_ref, mask_ref, out_ref):
    """Accumulate sum_s mask[b,s] * embeds[b,s,:] over the S grid axis.

    embeds_ref: (TB, TS, H)  bf16
    mask_ref:   (TB, TS, 1)  f32   (0/1 attention mask)
    out_ref:    (TB, 1,  H)  f32   pooled-sum accumulator (resident across S)
    """
    s = pl.program_id(1)

    @pl.when(s == 0)
    def _init():
        out_ref[...] = jnp.zeros_like(out_ref)

    prod = embeds_ref[...].astype(jnp.float32) * mask_ref[...]   # (TB, TS, H)
    out_ref[...] += jnp.sum(prod, axis=1, keepdims=True)          # (TB, 1, H)


# ---------------------------------------------------------------------------
# Kernel 2: batched MeanPoolingProjection head (dense -> tanh -> out_proj)
# ---------------------------------------------------------------------------
def head_kernel(sum_ref, cnt_ref, w1_ref, b1_ref, w2_ref, b2_ref, out_ref):
    """pooled = sum / count; logits = tanh(pooled @ w1 + b1) @ w2 + b2.

    sum_ref: (B, H) f32   cnt_ref: (B, 1) f32
    w1_ref:  (H, H) f32   b1_ref:  (1, H) f32
    w2_ref:  (H, Lpad) f32  b2_ref: (1, Lpad) f32
    out_ref: (B, Lpad) f32
    """
    counts = jnp.maximum(cnt_ref[...], 1.0)                       # (B, 1)
    pooled = sum_ref[...] / counts                                # (B, H) exact
    h = jnp.dot(pooled, w1_ref[...], preferred_element_type=jnp.float32)
    h = jnp.tanh(h + b1_ref[...])                                 # (B, H)
    logits = jnp.dot(h, w2_ref[...], preferred_element_type=jnp.float32)
    out_ref[...] = logits + b2_ref[...]                           # (B, Lpad)


# ---------------------------------------------------------------------------
# One-time parameter preparation (hoisted out of the per-call wrapper)
# ---------------------------------------------------------------------------
def prepare_params(params):
    h = params["w1"].shape[0]
    num_labels = params["w2"].shape[1]
    l_pad = max(LANE, pl.cdiv(num_labels, LANE) * LANE)
    w2_pad = jnp.zeros((h, l_pad), jnp.float32).at[:, :num_labels].set(
        params["w2"].astype(jnp.float32))
    b2_pad = jnp.zeros((1, l_pad), jnp.float32).at[:, :num_labels].set(
        params["b2"].reshape(1, -1).astype(jnp.float32))
    return {
        "w1": params["w1"].astype(jnp.float32),
        "b1": params["b1"].reshape(1, h).astype(jnp.float32),
        "w2_pad": w2_pad,
        "b2_pad": b2_pad,
        "num_labels": num_labels,
    }


# ---------------------------------------------------------------------------
# Wrapper: MeanPoolingHead (masked mean over seq + dense(tanh) + out_proj)
# ---------------------------------------------------------------------------
def mean_pooling_head(seq_embeds, attention_mask, prepared, *, ts=None, tb=1):
    """seq_embeds: (B, S, H) bf16/float; attention_mask: (B, S) 0/1.

    Returns logits (B, num_labels) float32.
    """
    B, S, H = seq_embeds.shape
    l_pad = prepared["w2_pad"].shape[1]
    num_labels = prepared["num_labels"]

    if ts is None:
        ts = S
        for cand in (2048, 1024, 512, 256):
            if S > cand and S % cand == 0:
                ts = cand
                break
    assert S % ts == 0, "sequence length must be divisible by the S tile"
    assert ts == S or ts % LANE == 0, "S tile must be lane-aligned or full S"
    assert B % tb == 0, "batch must be divisible by the batch tile"

    embeds_bf16 = seq_embeds.astype(jnp.bfloat16)   # no-op if already bf16
    mask_f32 = attention_mask.astype(jnp.float32)
    mask3 = mask_f32.reshape(B, S, 1)
    counts = jnp.maximum(jnp.sum(mask_f32, axis=1, keepdims=True), 1.0)  # (B,1)

    grid = (B // tb, S // ts)

    pooled_sum = pl.pallas_call(
        masked_sum_kernel,
        out_shape=jax.ShapeDtypeStruct((B, 1, H), jnp.float32),
        grid_spec=pltpu.PrefetchScalarGridSpec(
            num_scalar_prefetch=0,
            grid=grid,
            in_specs=[
                pl.BlockSpec((tb, ts, H), lambda b, s: (b, s, 0)),   # embeds
                pl.BlockSpec((tb, ts, 1), lambda b, s: (b, s, 0)),   # mask
            ],
            out_specs=pl.BlockSpec((tb, 1, H), lambda b, s: (b, 0, 0)),
        ),
        compiler_params=pltpu.CompilerParams(
            dimension_semantics=("parallel", "arbitrary"),
        ),
    )(embeds_bf16, mask3)

    logits_pad = pl.pallas_call(
        head_kernel,
        out_shape=jax.ShapeDtypeStruct((B, l_pad), jnp.float32),
    )(pooled_sum[:, 0, :], counts,
      prepared["w1"], prepared["b1"], prepared["w2_pad"], prepared["b2_pad"])

    return logits_pad[:, :num_labels]


# ---------------------------------------------------------------------------
# LoraModel forward (pooling_method='mean', non-PPI dataset branch)
# ---------------------------------------------------------------------------
def lora_model_forward(plm_embed_table_bf16, prepared, batch, *, ts=None, tb=1):
    aa_seq = batch["aa_seq_input_ids"]                 # (B, S) int32
    attention_mask = batch["aa_seq_attention_mask"]    # (B, S)

    # TODO(synk): the external plm_model (pretrained transformer encoder) has
    # no Pallas equivalent here; it is stubbed as a deterministic bf16
    # embedding lookup producing last_hidden_state.
    seq_embeds = jnp.take(plm_embed_table_bf16, aa_seq, axis=0)  # (B,S,H) bf16

    return mean_pooling_head(seq_embeds, attention_mask, prepared, ts=ts, tb=tb)


def reference_forward(plm_embed_table_bf16, params, batch):
    """Pure-JAX f32 reference (only the bf16 embedding rounding is shared)."""
    seq_embeds = jnp.take(plm_embed_table_bf16, batch["aa_seq_input_ids"],
                          axis=0).astype(jnp.float32)
    mask = batch["aa_seq_attention_mask"].astype(jnp.float32)
    counts = jnp.maximum(mask.sum(1, keepdims=True), 1.0)
    pooled = (seq_embeds * mask[:, :, None]).sum(1) / counts
    h = jnp.tanh(pooled @ params["w1"].astype(jnp.float32)
                 + params["b1"].reshape(1, -1))
    return h @ params["w2"].astype(jnp.float32) + params["b2"].reshape(1, -1)


if __name__ == "__main__":
    # Small shapes consistent with the module (lane-aligned for TPU tiling):
    # batch=2, seq=256, hidden=128, labels=4, vocab=33.
    B, S, H, L, VOCAB = 2, 256, 128, 4, 33

    key = jax.random.PRNGKey(0)
    k_emb, k_ids, k_w1, k_b1, k_w2, k_b2 = jax.random.split(key, 6)

    # Embedding table stored in bf16: the PLM stub writes bf16 activations
    # directly (no extra f32->bf16 HBM pass before the kernel).
    plm_embed_table = jax.random.normal(k_emb, (VOCAB, H),
                                        dtype=jnp.float32).astype(jnp.bfloat16)

    aa_seq = jax.random.randint(k_ids, (B, S), 0, VOCAB, dtype=jnp.int32)
    # attention mask with trailing padding on the second sequence
    lengths = jnp.array([S, S - 37], dtype=jnp.int32)
    attention_mask = (jnp.arange(S)[None, :] < lengths[:, None]).astype(jnp.int32)

    params = {
        "w1": jax.random.normal(k_w1, (H, H), dtype=jnp.float32) * 0.05,
        "b1": jax.random.normal(k_b1, (1, H), dtype=jnp.float32) * 0.01,
        "w2": jax.random.normal(k_w2, (H, L), dtype=jnp.float32) * 0.05,
        "b2": jax.random.normal(k_b2, (1, L), dtype=jnp.float32) * 0.01,
    }
    prepared = prepare_params(params)

    batch = {"aa_seq_input_ids": aa_seq, "aa_seq_attention_mask": attention_mask}

    ref = reference_forward(plm_embed_table, params, batch)

    # Multi-step S accumulation path: ts=128 -> grid=(2, 2), B axis parallel.
    logits = lora_model_forward(plm_embed_table, prepared, batch, ts=128, tb=1)
    jax.block_until_ready(logits)
    assert logits.shape == (B, L), logits.shape
    assert jnp.allclose(logits, ref, atol=2e-3, rtol=2e-2), (
        f"mismatch (ts=128):\n{logits}\nvs\n{ref}")

    # Default (large-tile) path: ts=S -> single S step per batch block.
    logits_full = lora_model_forward(plm_embed_table, prepared, batch)
    jax.block_until_ready(logits_full)
    assert jnp.allclose(logits_full, ref, atol=2e-3, rtol=2e-2), (
        f"mismatch (full-S tile):\n{logits_full}\nvs\n{ref}")

    print("KERNEL_OK")
</pallas_src>

<mosaic_0001>
module attributes {stable_mosaic.version = 11 : i64} {
  func.func @masked_sum_kernel(%arg0: i32, %arg1: i32, %arg2: memref<1x128x128xbf16, #tpu.memory_space<vmem>>, %arg3: memref<1x128x1xf32, #tpu.memory_space<vmem>>, %arg4: memref<1x1x128xf32, #tpu.memory_space<vmem>>) attributes {dimension_semantics = [#tpu.dimension_semantics<parallel>, #tpu.dimension_semantics<arbitrary>], iteration_bounds = array<i64: 2, 2>, scalar_prefetch = 0 : i64, scratch_operands = 0 : i64, tpu.core_type = #tpu.core_type<tc>, window_params = [{transform_indices = @transform_0, window_bounds = array<i64: 1, 128, 128>}, {transform_indices = @transform_1, window_bounds = array<i64: 1, 128, 1>}, {transform_indices = @transform_2, window_bounds = array<i64: 1, 1, 128>}]} {
    %c0_i32 = arith.constant 0 : i32
    %0 = arith.cmpi eq, %arg1, %c0_i32 : i32
    %1 = arith.extui %0 : i1 to i32
    %c0_i32_0 = arith.constant 0 : i32
    %2 = arith.cmpi ne, %1, %c0_i32_0 : i32
    scf.if %2 {
      %cst_12 = arith.constant 0.000000e+00 : f32
      %13 = vector.broadcast %cst_12 : f32 to vector<1x1x128xf32>
      %c0_13 = arith.constant 0 : index
      %c0_14 = arith.constant 0 : index
      %c0_15 = arith.constant 0 : index
      %14 = vector.load %arg4[%c0_13, %c0_14, %c0_15] : memref<1x1x128xf32, #tpu.memory_space<vmem>>, vector<1x1x128xf32>
      tpu.vector_store %arg4[%c0_13, %c0_14, %c0_15], %13 {strides = array<i32>} : memref<1x1x128xf32, #tpu.memory_space<vmem>>, vector<1x1x128xf32>,
    } else {
    }
    %c0 = arith.constant 0 : index
    %c0_1 = arith.constant 0 : index
    %c0_2 = arith.constant 0 : index
    %3 = vector.load %arg2[%c0, %c0_1, %c0_2] : memref<1x128x128xbf16, #tpu.memory_space<vmem>>, vector<1x128x128xbf16>
    %4 = arith.extf %3 : vector<1x128x128xbf16> to vector<1x128x128xf32>
    %c0_3 = arith.constant 0 : index
    %c0_4 = arith.constant 0 : index
    %c0_5 = arith.constant 0 : index
    %5 = vector.load %arg3[%c0_3, %c0_4, %c0_5] : memref<1x128x1xf32, #tpu.memory_space<vmem>>, vector<1x128x1xf32>
    %6 = vector.broadcast %5 : vector<1x128x1xf32> to vector<1x128x128xf32>
    %7 = arith.mulf %4, %6 : vector<1x128x128xf32>
    %c0_6 = arith.constant 0 : index
    %c0_7 = arith.constant 0 : index
    %c0_8 = arith.constant 0 : index
    %8 = vector.load %arg4[%c0_6, %c0_7, %c0_8] : memref<1x1x128xf32, #tpu.memory_space<vmem>>, vector<1x1x128xf32>
    %cst = arith.constant dense<0.000000e+00> : vector<1x128xf32>
    %9 = vector.multi_reduction <add>, %7, %cst [1] : vector<1x128x128xf32> to vector<1x128xf32>
    %10 = vector.shape_cast %9 : vector<1x128xf32> to vector<1x1x128xf32>
    %11 = arith.addf %8, %10 : vector<1x1x128xf32>
    %c0_9 = arith.constant 0 : index
    %c0_10 = arith.constant 0 : index
    %c0_11 = arith.constant 0 : index
    %12 = vector.load %arg4[%c0_9, %c0_10, %c0_11] : memref<1x1x128xf32, #tpu.memory_space<vmem>>, vector<1x1x128xf32>
    tpu.vector_store %arg4[%c0_9, %c0_10, %c0_11], %11 {strides = array<i32>} : memref<1x1x128xf32, #tpu.memory_space<vmem>>, vector<1x1x128xf32>,
    return
  }
  func.func @transform_0(%arg0: i32, %arg1: i32) -> (i32, i32, i32) {
    %c0_i32 = arith.constant 0 : i32
    %c0_i32_0 = arith.constant 0 : i32
    return %arg0, %arg1, %c0_i32 : i32, i32, i32
  }
  func.func @transform_1(%arg0: i32, %arg1: i32) -> (i32, i32, i32) {
    %c0_i32 = arith.constant 0 : i32
    %c0_i32_0 = arith.constant 0 : i32
    return %arg0, %arg1, %c0_i32 : i32, i32, i32
  }
  func.func @transform_2(%arg0: i32, %arg1: i32) -> (i32, i32, i32) {
    %c0_i32 = arith.constant 0 : i32
    %c0_i32_0 = arith.constant 0 : i32
    %c0_i32_1 = arith.constant 0 : i32
    return %arg0, %c0_i32, %c0_i32_0 : i32, i32, i32
  }
}

</mosaic_0001>

<bundles_post_ra>
// kernel: tpu_custom_call.1
= control target key start
LH: loop header
LB: loop body
LE: loop exit
PB: predicated region body
PF: predicated region fallthrough
CT: control target
= control target key end

     0   :  { %7 = vsyncpa [#allocation3], 0  ;;  %s899_s0 = inlined_call_operand.vmem [shape: bf16[2,256,128], index: 0, kind: input, shape index: {}]   ;;  %s900_s1 = inlined_call_operand.vmem [shape: f32[2,256,1], index: 1, kind: input, shape index: {}]   ;;  %s901_s2 = inlined_call_operand.hbm [shape: f32[2,1,128], index: 2, kind: output, shape index: {}]  }
   0x1   :  { %9 = vsyncpa [#allocation3 + $0x1], 0  ;;  %s724_s9 = smov 0   ;;  %s726_s10 = smov 0  }
   0x2   :  { %s728_s11 = smov 0   ;;  %s730_s12 = smov 0  }
   0x3   :  { %s732_s13 = smov 0   ;;  %s734_s14 = smov 0  }
   0x4   :  { %s736_s15 = smov 0   ;;  %s738_s16 = smov 0  }
   0x5 LB: > { %s481_s17 = sadd.s32 4294967295, %s704_s16   ;;  %s482_s18 = sadd.s32 4294967294, %s704_s16   ;;  %s704_s16 = sphi %s738_s16, %s15_s16   ;;  %s700_s15 = sphi %s736_s15, %s910_s15   ;;  %s696_s14 = sphi %s734_s14, %s909_s14   ;;  %s692_s13 = sphi %s732_s13, %s908_s13   ;;  %s688_s12 = sphi %s730_s12, %s907_s12   ;;  %s684_s11 = sphi %s728_s11, %s906_s11   ;;  %s680_s10 = sphi %s726_s10, %s905_s10   ;;  %s676_s9 = sphi %s724_s9, %s904_s9  }
   0x6   : > { %s24_s19 = sadd.s32 1, %s696_s14  ;;  %s27_s20 = sadd.s32 1, %s700_s15 }
   0x7   : > { %p25_p0 = scmp.ge.s32.totalorder %s24_s19, 2  ;;  %p100_p1 = scmp.ne.s32.totalorder %s684_s11, %s680_s10 }
   0x8   : > { %p101_p2 = scmp.eq.s32.totalorder %s481_s17, 3  ;;  %p106_p4 = scmp.ne.s32.totalorder %s680_s10, %s676_s9 }
   0x9   : > { %s912_s19 = smov (%p25_p0, %s24_s19), 0  ;;  %s914_s20 = smov (!%p25_p0, %s27_s20), %s700_s15 }
   0xa   : > { %p773_p3 = por %p101_p2, %p100_p1  ;;  %p29_p5 = scmp.ge.s32.totalorder %s914_s20, 2 }
   0xb   : > { %p107_p6 = scmp.eq.s32.totalorder %s482_s18, 3  ;;  %p485_p7 = scmp.ge.s32.totalorder %s704_s16, 1 }
   0xc   : > { %p151_p8 = scmp.lt.s32.totalorder %s704_s16, 5  ;;  %s916_s20 = smov (%p29_p5, %s914_s20), 0 }
   0xd   : > { %p783_p9 = por %p107_p6, %p106_p4  ;;  %s87_s23 = ssub.s32 %s700_s15, %s916_s20 }
   0xe   : > { %p152_p10 = pnand %p485_p7, %p151_p8  ;;  %s90_s24 = sadd.s32 1, %s684_s11 }
   0xf   : > { %p88_p11 = scmp.eq.s32.totalorder %s87_s23, 0  ;;  %s183_s26 = sand.u32 (!%p152_p10), 1, %s680_s10  }
  0x10   : > { %155 = sbr.rel (%p152_p10) target bundleno = 225 (0xe1), region = 28  ;;  %s486_s27 = sshll.u32 (!%p152_p10), %s688_s12, 4 }
  0x11   : > { %s791_s25 = scalar_select %p88_p11, %s684_s11, %s90_s24  }
  0x12   : > { %p186_p12 = scmp.lt.s32.totalorder (!%p152_p10), %s692_s13, 1  ;;  %p188_p13 = scmp.lt.s32.totalorder (!%p152_p10), %s486_s27, 31 }
  0x13   : > { %s809_s23 = scalar_lea.vmem (!%p152_p10), [#allocation2], %s183_s26  ;;  %p492_p0 = scmp.ne.s32.totalorder (!%p152_p10), %s688_s12, 0 }
  0x17   : > { %s187_s28 = scalar_select %p186_p12, %s692_s13, 1 }
  0x18   : > { %s918_s27 = smov (!%p188_p13, %s486_s27), 31  ;;  %208 = sbr.rel (%p492_p0) target bundleno = 31 (0x1f), region = 32 }
  0x19   : > { %s487_s29 = sshll.u32 %s187_s28, 5  ;;  %v706_v0 = vmov (!%p492_p0), 0.0  }
  0x1a   : > { %s191_s30 = sadd.s32 %s487_s29, %s918_s27  ;;  %209 = vst [vmem:[%s809_s23] sm:$0x1] (!%p492_p0), %v706_v0 }
  0x1b   : > { %s488_s3 = sshll.u32 %s191_s30, 2  ;;  %s491_s4 = sshll.u32 %s191_s30, 3 }
  0x1c   : > { %s800_s7 = scalar_lea.vmem %s899_s0, %s488_s3  ;;  %s805_s18 = scalar_lea.vmem %s900_s1, %s491_s4 }
  0x1f PF: > { %v244_v1 = vld [vmem:[%s805_s18 + $0x10] sm:$0xff]  ;;  %v242_v2 = vld [vmem:[%s805_s18] sm:$0xff]  ;;  %v707_v3 = vmov 0   ;;  %v245_v4 = vld [vmem:[%s805_s18 + $0x18] sm:$0xff]  ;;  %s493_s12 = sshll.u32 %s692_s13, 4  ;;  %s391_s24 = sshll.u32 %s809_s23, 4  ;;  %s845_s24 = int_to_ptr.vmem [resolvable:$true] %s391_s24 }
  0x20   : > { %609 = vset.pattern.permute.xlu1 %v707_v3  ;;  %608 = vset.pattern.permute.xlu0 %v707_v3  ;;  %v243_v5 = vld [vmem:[%s805_s18 + $0x8] sm:$0xff]  ;;  %v246_v7 = vld [vmem:[%s805_s18 + $0x20] sm:$0xff]  ;;  %v249_v8 = vld [vmem:[%s805_s18 + $0x38] sm:$0xff]  ;;  %s843_s29 = scalar_lea.hbm %s901_s2, %s493_s12  ;;  %s379_s30 = scalar_lea.sflag [#allocation3], %s183_s26 }
  0x21   : > { %270 = vperm.xlu1 %609, %v244_v1   ;;  %260 = vperm.xlu0 %608, %v242_v2   ;;  %v247_v6 = vld [vmem:[%s805_s18 + $0x28] sm:$0xff]  ;;  %v248_v9 = vld [vmem:[%s805_s18 + $0x30] sm:$0xff]  ;;  %v250_v11 = vld [vmem:[%s805_s18 + $0x40] sm:$0xff]  ;;  %s610_s3 = scalar_lea.vmem %s845_s24, 16  ;;  %s708_s13 = smov [#allocation2]  }
  0x22   : > { %v251_v10 = vld [vmem:[%s805_s18 + $0x48] sm:$0xff]  ;;  %v253_v12 = vld [vmem:[%s805_s18 + $0x58] sm:$0xff]  ;;  %v252_v13 = vld [vmem:[%s805_s18 + $0x50] sm:$0xff]  ;;  %p611_p1 = scmp.ne.s32.totalorder %s845_s24, %s610_s3  ;;  %s614_s4 = sshll.u32 %s708_s13, 4  ;;  %s615_s4 = int_to_ptr.vmem [resolvable:$false] %s614_s4 }
  0x23   : > { %v255_v14 = vld [vmem:[%s805_s18 + $0x68] sm:$0xff]  ;;  %v254_v15 = vld [vmem:[%s805_s18 + $0x60] sm:$0xff]  ;;  %v257_v16 = vld [vmem:[%s805_s18 + $0x78] sm:$0xff]  ;;  %s616_s5 = scalar_lea.vmem %s615_s4, 32  ;;  %p617_p5 = scmp.lt.s32.totalorder %s845_s24, %s615_s4 }
  0x24   : > { %v256_v17 = vld [vmem:[%s805_s18 + $0x70] sm:$0xff]  ;;  %v497_v18 = vld [vmem:[%s800_s7] sm:$0xff]   ;;  %v528_v20 = vld [vmem:[%s800_s7 + $0x8] sm:$0xff]   ;;  %p612_p2 = pnand %p611_p1, %p773_p3  ;;  %p618_p6 = scmp.lt.s32.totalorder %s616_s5, %s610_s3 }
  0x25   : > { %275 = vperm.xlu1 %609, %v245_v4   ;;  %265 = vperm.xlu0 %608, %v243_v5   ;;  %v498_v22 = vunpack.c.l.bf16 %v497_v18  ;;  %v499_v23 = vunpack.c.h.bf16 %v497_v18  ;;  %v502_v24 = vunpack.c.l.bf16 %v528_v20  ;;  %v529_v27 = vld [vmem:[%s800_s7 + $0x10] sm:$0xff]   ;;  %v503_v29 = vunpack.c.h.bf16 %v528_v20  ;;  %v530_v36 = vld [vmem:[%s800_s7 + $0x18] sm:$0xff]   ;;  %v531_v45 = vld [vmem:[%s800_s7 + $0x20] sm:$0xff]  }
  0x26   : > { %v506_v33 = vunpack.c.l.bf16 %v529_v27  ;;  %v507_v39 = vunpack.c.h.bf16 %v529_v27  ;;  %v510_v42 = vunpack.c.l.bf16 %v530_v36  ;;  %v511_v48 = vunpack.c.h.bf16 %v530_v36  ;;  %v532_v54 = vld [vmem:[%s800_s7 + $0x28] sm:$0xff]   ;;  %v533_v63 = vld [vmem:[%s800_s7 + $0x30] sm:$0xff]   ;;  %p613_p4 = pneg %p612_p2  ;;  %p619_p7 = por %p618_p6, %p617_p5 }
  0x27   : > { %v514_v51 = vunpack.c.l.bf16 %v531_v45  ;;  %v515_v57 = vunpack.c.h.bf16 %v531_v45  ;;  %v518_v60 = vunpack.c.l.bf16 %v532_v54  ;;  %v519_v2 = vunpack.c.h.bf16 %v532_v54 }
  0x28   : > { %v522_v5 = vunpack.c.l.bf16 %v533_v63  ;;  %p620_p8 = pnand %p619_p7, %p613_p4 }
  0x29   : > { %285 = vperm.xlu1 %609, %v247_v6   ;;  %280 = vperm.xlu0 %608, %v246_v7  }
  0x2d   : > { %295 = vperm.xlu1 %609, %v249_v8   ;;  %290 = vperm.xlu0 %608, %v248_v9   ;;  %v534_v8 = vld [vmem:[%s800_s7 + $0x38] sm:$0xff]  }
  0x2e   : > { %v527_v18 = vunpack.c.h.bf16 %v534_v8 }
  0x31   : > { %305 = vperm.xlu1 %609, %v251_v10   ;;  %300 = vperm.xlu0 %608, %v250_v11   ;;  %v523_v11 = vunpack.c.h.bf16 %v533_v63 }
  0x35   : > { %315 = vperm.xlu1 %609, %v253_v12   ;;  %310 = vperm.xlu0 %608, %v252_v13  }
  0x39   : > { %325 = vperm.xlu1 %609, %v255_v14   ;;  %320 = vperm.xlu0 %608, %v254_v15   ;;  %v526_v14 = vunpack.c.l.bf16 %v534_v8 }
  0x3d   : > { %335 = vperm.xlu1 %609, %v257_v16   ;;  %330 = vperm.xlu0 %608, %v256_v17  }
  0xa0   : > { %v271_v19 = vpop.permute.xlu1 %270  ;;  %v261_v21 = vpop.permute.xlu0 %260 }
  0xa1   : > { %v338_v28 = vmul.f32 %v498_v22, %v261_v21  ;;  %v340_v31 = vmul.f32 %v502_v24, %v271_v19 }
  0xa4   : > { %v276_v25 = vpop.permute.xlu1 %275  ;;  %v266_v26 = vpop.permute.xlu0 %265 }
  0xa5   : > { %v339_v30 = vmul.f32 %v499_v23, %v266_v26  ;;  %v341_v37 = vmul.f32 %v503_v29, %v276_v25 }
  0xa7   : > { %v355_v32 = vadd.f32 %v339_v30, %v338_v28  ;;  %v354_v30 = vld [vmem:[%s809_s23] sm:$0x1] }
  0xa8   : > { %v286_v34 = vpop.permute.xlu1 %285  ;;  %v281_v35 = vpop.permute.xlu0 %280 }
  0xa9   : > { %v356_v38 = vadd.f32 %v355_v32, %v340_v31  ;;  %v342_v40 = vmul.f32 %v506_v33, %v281_v35  ;;  %v343_v46 = vmul.f32 %v507_v39, %v286_v34 }
  0xab   : > { %v357_v41 = vadd.f32 %v356_v38, %v341_v37 }
  0xac   : > { %v296_v43 = vpop.permute.xlu1 %295  ;;  %v291_v44 = vpop.permute.xlu0 %290 }
  0xad   : > { %v358_v47 = vadd.f32 %v357_v41, %v342_v40  ;;  %v344_v49 = vmul.f32 %v510_v42, %v291_v44  ;;  %v345_v55 = vmul.f32 %v511_v48, %v296_v43 }
  0xaf   : > { %v359_v50 = vadd.f32 %v358_v47, %v343_v46 }
  0xb0   : > { %v306_v52 = vpop.permute.xlu1 %305  ;;  %v301_v53 = vpop.permute.xlu0 %300 }
  0xb1   : > { %v360_v56 = vadd.f32 %v359_v50, %v344_v49  ;;  %v346_v58 = vmul.f32 %v514_v51, %v301_v53  ;;  %v347_v0 = vmul.f32 %v515_v57, %v306_v52 }
  0xb3   : > { %v361_v59 = vadd.f32 %v360_v56, %v345_v55 }
  0xb4   : > { %v316_v61 = vpop.permute.xlu1 %315  ;;  %v311_v62 = vpop.permute.xlu0 %310 }
  0xb5   : > { %v362_v1 = vadd.f32 %v361_v59, %v346_v58  ;;  %v348_v3 = vmul.f32 %v518_v60, %v311_v62  ;;  %v349_v9 = vmul.f32 %v519_v2, %v316_v61 }
  0xb7   : > { %v363_v4 = vadd.f32 %v362_v1, %v347_v0 }
  0xb8   : > { %v326_v6 = vpop.permute.xlu1 %325  ;;  %v321_v7 = vpop.permute.xlu0 %320 }
  0xb9   : > { %v364_v10 = vadd.f32 %v363_v4, %v348_v3  ;;  %v350_v12 = vmul.f32 %v522_v5, %v321_v7  ;;  %v351_v16 = vmul.f32 %v523_v11, %v326_v6 }
  0xbb   : > { %v365_v13 = vadd.f32 %v364_v10, %v349_v9 }
  0xbc   : > { %v331_v15 = vpop.permute.xlu0 %330  ;;  %v336_v19 = vpop.permute.xlu1 %335 }
  0xbd   : > { %v366_v17 = vadd.f32 %v365_v13, %v350_v12  ;;  %v352_v20 = vmul.f32 %v526_v14, %v331_v15  ;;  %v353_v22 = vmul.f32 %v527_v18, %v336_v19 }
  0xbf   : > { %v367_v21 = vadd.f32 %v366_v17, %v351_v16 }
  0xc1   : > { %v368_v23 = vadd.f32 %v367_v21, %v352_v20 }
  0xc3   : > { %v369_v24 = vadd.f32 %v368_v23, %v353_v22 }
  0xc5   : > { %v370_v25 = vrot.slane %v369_v24, 4 }
  0xc7   : > { %v371_v26 = vadd.f32 %v370_v25, %v369_v24 }
  0xc9   : > { %v372_v27 = vrot.slane %v371_v26, 2 }
  0xcb   : > { %v373_v28 = vadd.f32 %v372_v27, %v371_v26 }
  0xcd   : > { %v374_v29 = vrot.slane %v373_v28, 1 }
  0xcf   : > { %v375_v31 = vadd.f32 %v374_v29, %v373_v28 }
  0xd1   : > { %v376_v32 = vadd.f32 %v375_v31, %v354_v30 }
  0xd3   : > { %377 = vst [vmem:[%s809_s23] sm:$0x1] %v376_v32 }
  0xd4   : > { %623 = shalt.err (!%p620_p8)
}
  0xd5   : > { %s624_s26 = scalar_lea.hbm %s843_s29, 16  ;;  %s628_s8 = scalar_lea.hbm %s901_s2, 32 }
  0xd6   : > { %p625_p10 = scmp.ne.s32.totalorder %s843_s29, %s624_s26  ;;  %p629_p13 = scmp.lt.u32.totalorder %s843_s29, %s901_s2 }
  0xd7   : > { %p630_p0 = scmp.lt.u32.totalorder %s628_s8, %s624_s26  ;;  %p632_p2 = scmp.lt.u32.totalorder %s624_s26, %s843_s29 }
  0xd8   : > { %p626_p11 = pnand %p625_p10, %p773_p3 }
  0xd9   : > { %p631_p1 = por %p630_p0, %p629_p13 }
  0xda   : > { %p627_p12 = pneg %p626_p11 }
  0xdb   : > { %p633_p4 = por %p632_p2, %p631_p1 }
  0xdd   : > { %p634_p5 = pnand %p633_p4, %p627_p12 }
  0xdf   : > { %637 = shalt.err (!%p634_p5)
}
  0xe0   : > { %535 = dma.vmem_to_hbm [thread:$0]  (%p773_p3), %s845_s24, 16, %s843_s29, %s379_s30  }
  0xe1 PF: > { %p541_p6 = scmp.ge.s32.totalorder %s704_s16, 2  ;;  %s403_s23 = sand.u32 1, %s676_s9  }
  0xe2   : > { %s404_s12 = scalar_lea.sflag [#allocation3], %s403_s23 }
  0xe3   : > { %p538_p7 = pnand %p541_p6, %p783_p9 }
  0xe5   : > { %671 = dma.done.wait (!%p538_p7), %s404_s12, 16  }
  0xe6   : > { %673 = vsyncadd (!%p538_p7), %s404_s12, 4294967280  ;;  %s15_s16 = sadd.s32 1, %s704_s16   ;;  %s904_s9 = smov %s680_s10 }
  0xe7   : > { %p12_p8 = scmp.ge.s32.totalorder %s15_s16, 6   ;;  %s905_s10 = smov %s684_s11 }
  0xe8   : > { %s906_s11 = smov %s791_s25  ;;  %s907_s12 = smov %s696_s14 }
  0xe9   : > { %s908_s13 = smov %s700_s15  ;;  %s909_s14 = smov %s912_s19 }
  0xea   : > { %s910_s15 = smov %s916_s20  ;;  %14 = sbr.rel (!%p12_p8) target bundleno = 5 (0x5), region = 70 }
  0xf1   :  { %408 = vsyncpa [#allocation3], 1 }
  0xf2   :  { %410 = vsyncpa [#allocation3 + $0x1], 1 }

</bundles_post_ra>
